<compile_context>
chip_gen: v7x
topology: tpu7x:2x2x1
jax: 0.10.0
libtpu: 0.0.40
codegen_flags: <defaults>
</compile_context>

<pallas_src>
import jax
import jax.numpy as jnp
from jax.experimental import pallas as pl
from jax.experimental.pallas import tpu as pltpu


def _samo_kernel(x_ref, w_ref, b_ref, o_ref):
    # x_ref: (C, Lt) slab of one batch element, native dtype.
    # w_ref: (1, C) weights in x's dtype (VMEM).
    # b_ref: (1, 1) f32 bias in SMEM.
    x = x_ref[...]
    # Channel reduction on the MXU, f32 accumulation: (1, C) @ (C, Lt) -> (1, Lt).
    logits = jnp.dot(w_ref[...], x, preferred_element_type=jnp.float32)
    logits = logits + b_ref[0, 0]
    mask = jax.nn.sigmoid(logits)                     # exp + reciprocal on the EUP
    # Final modulation in the input's native dtype (no full-slab f32 temp).
    o_ref[...] = x * mask.astype(x_ref.dtype)


def _vmem_plan():
    """Generation-aware VMEM budgeting.

    Returns (vmem_limit_bytes, per_block_budget_bytes). Keeps
    2x(in block) + 2x(out block) + compiler scratch comfortably under the
    scoped limit (v7x has only 64 MiB physical VMEM per TensorCore, while
    v5e/v6e have 128 MiB).
    """
    cap = None
    try:
        cap = getattr(pltpu.get_tpu_info(), "vmem_capacity_bytes", None)
    except Exception:
        cap = None
    if not cap:
        cap = 64 * 1024 * 1024          # conservative: v7x per-TC VMEM
    vmem_limit = min(64 * 1024 * 1024, (3 * cap) // 4)
    block_budget = min(8 * 1024 * 1024, vmem_limit // 6)
    return vmem_limit, block_budget


def _pick_lane_tile(hw, c, itemsize, budget):
    """Lane-tile size: a multiple of 128 (or full hw) with (C, lt) <= budget."""
    max_lt = max(128, ((budget // max(1, c * itemsize)) // 128) * 128)
    if hw <= max_lt:
        return hw                        # single full-extent block (always legal)
    if hw % 128 == 0:
        lt = max_lt
        while lt >= 128 and hw % lt != 0:
            lt -= 128
        if lt >= max_lt // 2:            # exact division without shrinking too much
            return lt
    return max_lt                        # partial last block; writeback is masked


def samo_forward(x, weight, bias):
    """Pallas implementation of SAMO.forward.

    Args:
      x:      (B, C, H, W) feature map.
      weight: (1, C, 1, 1) 1x1-conv weight (torch layout).
      bias:   (1,) conv bias.
    Returns:
      (B, C, H, W) modulated feature map, same dtype as x.
    """
    B, C, H, W = x.shape
    HW = H * W

    x2 = x.reshape(B, C, HW)
    # Weight in x's dtype so the MXU dot runs natively (f32 accumulation keeps
    # the logits precise); bias stays f32 in SMEM.
    w2 = weight.reshape(1, C).astype(x.dtype)
    b2 = bias.reshape(1, 1).astype(jnp.float32)

    vmem_limit, block_budget = _vmem_plan()
    lt = _pick_lane_tile(HW, C, x.dtype.itemsize, block_budget)
    grid = (B, pl.cdiv(HW, lt))

    out = pl.pallas_call(
        _samo_kernel,
        out_shape=jax.ShapeDtypeStruct((B, C, HW), x.dtype),
        grid=grid,
        in_specs=[
            pl.BlockSpec((None, C, lt), lambda b, l: (b, 0, l)),      # x slab
            pl.BlockSpec((1, C), lambda b, l: (0, 0)),                # weight
            pl.BlockSpec(memory_space=pltpu.MemorySpace.SMEM),        # bias
        ],
        out_specs=pl.BlockSpec((None, C, lt), lambda b, l: (b, 0, l)),
        compiler_params=pltpu.CompilerParams(
            dimension_semantics=("parallel", "parallel"),
            vmem_limit_bytes=vmem_limit,
        ),
    )(x2, w2, b2)

    return out.reshape(B, C, H, W)


def _samo_reference(x, weight, bias):
    w_flat = weight.reshape(-1).astype(jnp.float32)                   # (C,)
    logits = jnp.einsum("bchw,c->bhw", x.astype(jnp.float32), w_flat)
    logits = logits + bias.astype(jnp.float32)[0]
    mask = jax.nn.sigmoid(logits)[:, None, :, :]
    return (x.astype(jnp.float32) * mask).astype(x.dtype)


if __name__ == "__main__":
    key = jax.random.PRNGKey(0)
    kx, kw, kb = jax.random.split(key, 3)

    B, C, H, W = 2, 4, 16, 16
    x = jax.random.normal(kx, (B, C, H, W), dtype=jnp.float32)
    weight = jax.random.normal(kw, (1, C, 1, 1), dtype=jnp.float32) * 0.1
    bias = jax.random.normal(kb, (1,), dtype=jnp.float32) * 0.1

    out = samo_forward(x, weight, bias)
    out = jax.block_until_ready(out)

    ref = _samo_reference(x, weight, bias)

    assert out.shape == x.shape
    assert out.dtype == x.dtype
    assert bool(jnp.allclose(out, ref, rtol=1e-5, atol=1e-5))

    print("KERNEL_OK")
</pallas_src>

<mosaic_0001>
module attributes {stable_mosaic.version = 11 : i64} {
  func.func @_samo_kernel(%arg0: i32, %arg1: i32, %arg2: memref<1x4x256xf32, #tpu.memory_space<vmem>>, %arg3: memref<1x4xf32, #tpu.memory_space<vmem>>, %arg4: memref<1x1xf32, #tpu.memory_space<smem>>, %arg5: memref<1x4x256xf32, #tpu.memory_space<vmem>>) attributes {dimension_semantics = [#tpu.dimension_semantics<parallel>, #tpu.dimension_semantics<parallel>], iteration_bounds = array<i64: 2, 1>, scalar_prefetch = 0 : i64, scratch_operands = 0 : i64, tpu.core_type = #tpu.core_type<tc>, window_params = [{transform_indices = @transform_0, window_bounds = array<i64: 1, 4, 256>}, {pipeline_mode = #tpu.pipeline_mode<synchronous>, transform_indices = @transform_1, window_bounds = array<i64: 1, 4>}, {transform_indices = @transform_2, window_bounds = array<i64: 1, 1>}, {transform_indices = @transform_3, window_bounds = array<i64: 1, 4, 256>}]} {
    %c0 = arith.constant 0 : index
    %c0_0 = arith.constant 0 : index
    %c0_1 = arith.constant 0 : index
    %0 = vector.load %arg2[%c0, %c0_0, %c0_1] : memref<1x4x256xf32, #tpu.memory_space<vmem>>, vector<1x4x256xf32>
    %1 = vector.shape_cast %0 : vector<1x4x256xf32> to vector<4x256xf32>
    %c0_2 = arith.constant 0 : index
    %c0_3 = arith.constant 0 : index
    %2 = vector.load %arg3[%c0_2, %c0_3] : memref<1x4xf32, #tpu.memory_space<vmem>>, vector<1x4xf32>
    %cst = arith.constant dense<0.000000e+00> : vector<1x256xf32>
    %3 = tpu.matmul %2, %1, %cst {dimension_numbers = #tpu.dot_dimension_numbers<[1], [0], [0], [1], [0, 0, 1, 1], [], []>} : vector<1x4xf32>, vector<4x256xf32>, vector<1x256xf32> -> vector<1x256xf32>
    %c0_4 = arith.constant 0 : index
    %c0_5 = arith.constant 0 : index
    %4 = memref.load %arg4[%c0_4, %c0_5] : memref<1x1xf32, #tpu.memory_space<smem>>
    %5 = vector.broadcast %4 : f32 to vector<1x256xf32>
    %6 = arith.addf %3, %5 : vector<1x256xf32>
    %7 = arith.negf %6 : vector<1x256xf32>
    %8 = math.exp %7 : vector<1x256xf32>
    %cst_6 = arith.constant 1.000000e+00 : f32
    %9 = vector.broadcast %cst_6 : f32 to vector<1x256xf32>
    %10 = arith.addf %9, %8 : vector<1x256xf32>
    %11 = arith.divf %9, %10 : vector<1x256xf32>
    %12 = vector.broadcast %11 : vector<1x256xf32> to vector<4x256xf32>
    %13 = arith.mulf %1, %12 : vector<4x256xf32>
    %c0_7 = arith.constant 0 : index
    %c0_8 = arith.constant 0 : index
    %c0_9 = arith.constant 0 : index
    %14 = vector.load %arg5[%c0_7, %c0_8, %c0_9] : memref<1x4x256xf32, #tpu.memory_space<vmem>>, vector<1x4x256xf32>
    %15 = vector.shape_cast %14 : vector<1x4x256xf32> to vector<4x256xf32>
    %16 = vector.shape_cast %13 : vector<4x256xf32> to vector<1x4x256xf32>
    tpu.vector_store %arg5[%c0_7, %c0_8, %c0_9], %16 {strides = array<i32>} : memref<1x4x256xf32, #tpu.memory_space<vmem>>, vector<1x4x256xf32>,
    return
  }
  func.func @transform_0(%arg0: i32, %arg1: i32) -> (i32, i32, i32) {
    %c0_i32 = arith.constant 0 : i32
    %c0_i32_0 = arith.constant 0 : i32
    return %arg0, %c0_i32, %arg1 : i32, i32, i32
  }
  func.func @transform_1(%arg0: i32, %arg1: i32) -> (i32, i32) {
    %c0_i32 = arith.constant 0 : i32
    %c0_i32_0 = arith.constant 0 : i32
    %c0_i32_1 = arith.constant 0 : i32
    return %c0_i32, %c0_i32_0 : i32, i32
  }
  func.func @transform_2(%arg0: i32, %arg1: i32) -> (i32, i32) {
    %c0_i32 = arith.constant 0 : i32
    %c0_i32_0 = arith.constant 0 : i32
    %c0_i32_1 = arith.constant 0 : i32
    return %c0_i32, %c0_i32_0 : i32, i32
  }
  func.func @transform_3(%arg0: i32, %arg1: i32) -> (i32, i32, i32) {
    %c0_i32 = arith.constant 0 : i32
    %c0_i32_0 = arith.constant 0 : i32
    return %arg0, %c0_i32, %arg1 : i32, i32, i32
  }
}

</mosaic_0001>

<bundles_post_ra>
// kernel: tpu_custom_call.1
= control target key start
LH: loop header
LB: loop body
LE: loop exit
PB: predicated region body
PF: predicated region fallthrough
CT: control target
= control target key end

     0   :  { %s834_s0 = inlined_call_operand.hbm [shape: f32[2,4,256], index: 0, kind: input, shape index: {}]   ;;  %s835_s1 = inlined_call_operand.vmem [shape: f32[1,4], index: 1, kind: input, shape index: {}]   ;;  %s836_s2 = inlined_call_operand.<no memory space> [shape: f32[1,1], index: 2, kind: input, shape index: {}]   ;;  %s837_s3 = inlined_call_operand.hbm [shape: f32[2,4,256], index: 3, kind: output, shape index: {}]  }
   0x1   :  { %8 = sst [smem:[#allocation2]] %s836_s2 }
   0x2   :  { %9 = vsyncpa [#allocation4], 0 }
   0x3   :  { %11 = vsyncpa [#allocation4 + $0x1], 0 }
   0x4   :  { %12 = vsyncpa [#allocation5], 0 }
   0x5   :  { %14 = vsyncpa [#allocation5 + $0x1], 0  ;;  %s655_s14 = smov 0   ;;  %s657_s15 = smov 0  }
   0x6   :  { %s659_s16 = smov 0   ;;  %s661_s17 = smov 0  }
   0x7   :  { %s663_s18 = smov 0   ;;  %s665_s19 = smov 0  }
   0x8 LB: > { %s421_s2 = sadd.s32 4294967295, %s627_s19   ;;  %s422_s20 = sadd.s32 4294967294, %s627_s19   ;;  %s627_s19 = sphi %s665_s19, %s20_s19   ;;  %s623_s18 = sphi %s663_s18, %s853_s18   ;;  %s619_s17 = sphi %s661_s17, %s852_s17   ;;  %s615_s16 = sphi %s659_s16, %s851_s16   ;;  %s611_s15 = sphi %s657_s15, %s850_s15   ;;  %s607_s14 = sphi %s655_s14, %s849_s14  }
   0x9   : > { %s32_s21 = sadd.s32 1, %s623_s18  ;;  %s41_s22 = sadd.s32 1, %s615_s16 }
   0xa   : > { %p34_p0 = scmp.ge.s32.totalorder %s32_s21, 2  ;;  %p48_p1 = scmp.ne.s32.totalorder %s615_s16, %s611_s15 }
   0xb   : > { %p49_p2 = scmp.eq.s32.totalorder %s627_s19, 0  ;;  %p54_p3 = scmp.ne.s32.totalorder %s611_s15, %s607_s14 }
   0xc   : > { %s855_s21 = smov (%p34_p0, %s32_s21), 0  ;;  %p55_p5 = scmp.eq.s32.totalorder %s421_s2, 0 }
   0xd   : > { %p696_p4 = por %p49_p2, %p48_p1  ;;  %s36_s24 = ssub.s32 %s623_s18, %s855_s21 }
   0xe   : > { %p122_p6 = scmp.eq.s32.totalorder %s421_s2, 1  ;;  %p39_p7 = scmp.eq.s32.totalorder %s36_s24, 0 }
   0xf   : > { %p702_p8 = por %p55_p5, %p54_p3  ;;  %p128_p10 = scmp.eq.s32.totalorder %s422_s20, 1 }
  0x10   : > { %p706_p9 = por %p122_p6, %p48_p1  ;;  %p455_p13 = scmp.lt.s32.totalorder %s627_s19, 2 }
  0x11   : > { %s711_s27 = scalar_select %p39_p7, %s615_s16, %s41_s22  }
  0x12   : > { %s841_s26 = scalar_select %p706_p9, 1, 0 }
  0x13   : > { %p713_p11 = por %p128_p10, %p54_p3  ;;  %s154_s29 = sand.u32 1, %s615_s16  }
  0x14   : > { %s425_s30 = sshll.u32 %s154_s29, 3  ;;  %s441_s4 = sshll.u32 %s623_s18, 7 }
  0x15   : > { %s842_s28 = scalar_select %p713_p11, 1, 0 }
  0x16   : > { %s724_s7 = scalar_lea.hbm %s834_s0, %s441_s4  ;;  %s158_s8 = scalar_lea.vmem [#allocation3], %s425_s30 }
  0x17   : > { %s168_s9 = sshll.u32 %s158_s8, 4  ;;  %p730_p0 = pnand %p455_p13, %p696_p4  ;;  %s726_s9 = int_to_ptr.vmem [resolvable:$true] %s168_s9 }
  0x18   : > { %s155_s11 = scalar_lea.sflag [#allocation4], %s154_s29  ;;  %s515_s12 = scalar_lea.hbm %s724_s7, 128 }
  0x19   : > { %p516_p3 = scmp.ne.s32.totalorder %s724_s7, %s515_s12  ;;  %p517_p5 = pneg %p730_p0 }
  0x1a   : > { %s520_s20 = scalar_lea.hbm %s834_s0, 256  ;;  %p521_p4 = scmp.lt.u32.totalorder %s724_s7, %s834_s0 }
  0x1b   : > { %p518_p6 = pnand %p517_p5, %p516_p3  ;;  %p522_p10 = scmp.lt.u32.totalorder %s520_s20, %s515_s12 }
  0x1c   : > { %p524_p12 = scmp.lt.u32.totalorder %s515_s12, %s724_s7 }
  0x1d   : > { %p519_p7 = pneg %p518_p6  ;;  %p523_p13 = por %p522_p10, %p521_p4 }
  0x1f   : > { %p525_p1 = por %p524_p12, %p523_p13 }
  0x21   : > { %p526_p2 = pnand %p525_p1, %p519_p7 }
  0x23   : > { %529 = shalt.err (!%p526_p2)
}
  0x24   : > { %s530_s24 = scalar_lea.vmem %s726_s9, 128  ;;  %s629_s29 = smov [#allocation3]  }
  0x25   : > { %p531_p3 = scmp.ne.s32.totalorder %s726_s9, %s530_s24  ;;  %s535_s30 = sshll.u32 %s629_s29, 4  ;;  %s536_s30 = int_to_ptr.vmem [resolvable:$false] %s535_s30 }
  0x26   : > { %s537_s4 = scalar_lea.vmem %s536_s30, 256  ;;  %p538_p9 = scmp.lt.s32.totalorder %s726_s9, %s536_s30 }
  0x27   : > { %p533_p6 = pnand %p531_p3, %p517_p5  ;;  %p539_p4 = scmp.lt.s32.totalorder %s537_s4, %s530_s24 }
  0x29   : > { %p534_p11 = pneg %p533_p6  ;;  %p540_p10 = por %p539_p4, %p538_p9 }
  0x2b   : > { %p541_p12 = pnand %p540_p10, %p534_p11 }
  0x2d   : > { %544 = shalt.err (!%p541_p12)
}
  0x2e   : > { %450 = dma.hbm_to_vmem [thread:$0]  (!%p730_p0), %s724_s7, 128, %s726_s9, %s155_s11  }
  0x2f   : > { %p844_p1 = scmp.lt.s32.totalorder %s627_s19, 3  ;;  %p845_p2 = scmp.ge.s32.totalorder %s627_s19, 1 }
  0x31   : > { %p174_p5 = pnand %p845_p2, %p844_p1 }
  0x32   : > { %s766_s5 = sand.u32 (!%p174_p5), 1, %s611_s15  }
  0x33   : > { %177 = sbr.rel (%p174_p5) target bundleno = 325 (0x145), region = 32  ;;  %s429_s6 = sshll.u32 (!%p174_p5), %s766_s5, 3 }
  0x34   : > { %s180_s8 = scalar_lea.sflag (!%p174_p5), [#allocation4], %s766_s5  ;;  %s183_s10 = scalar_lea.vmem (!%p174_p5), [#allocation3], %s429_s6 }
  0x3a   : > { %598 = dma.done.wait (%p702_p8), %s180_s8, 128  }
  0x3b   : > { %600 = vsyncadd (%p702_p8), %s180_s8, 4294967168  ;;  %v630_v0 = vmov 0.0   ;;  %v208_v1 = vld [vmem:[%s183_s10] sm:$0xff]  ;;  %vm218_vm0 = vcmask 1043456   ;;  %vm214_vm1 = vcmask 31744   ;;  %s210_s11 = sld [smem:[#allocation2]]  ;;  %v306_v15 = vlaneseq }
  0x3c   : > { %287 = vmatprep.mubr.f32.mxu0 %v630_v0  ;;  %v213_v2 = vcombine.high %v208_v1, %v208_v1  ;;  %v209_v3 = vld [vmem:[%s835_s1] sm:$0x1]  ;;  %s442_s25 = sshll.u32 %s619_s17, 7  ;;  %s205_s12 = scalar_lea.vmem [#allocation6], %s429_s6 }
  0x3d   : > { %v307_v16 = vshrl.u32 %v306_v15, 7  ;;  %s337_s13 = sshll.u32 %s205_s12, 4  ;;  %s785_s22 = scalar_lea.hbm %s837_s3, %s442_s25  ;;  %s787_s13 = int_to_ptr.vmem [resolvable:$true] %s337_s13 }
  0x3e   : > { %431 = vmatprep.subr.msk.mxu0 %vm218_vm0, %v213_v2  ;;  %s321_s23 = scalar_lea.sflag [#allocation5], %s766_s5  ;;  %s545_s24 = scalar_lea.vmem %s787_s13, 128 }
  0x3f   : > { %432 = vmatpush1.msk.msra.mxu0 %vm218_vm0, %v208_v1  ;;  %v308_v17 = vsub.s32 0, %v307_v16  ;;  %p546_p8 = scmp.ne.s32.totalorder %s787_s13, %s545_s24  ;;  %p846_p9 = scmp.ne.s32.totalorder %s841_s26, 0 }
  0x40   : > { %433 = vmatmul.mubr.msk.f32.vlgmr.msra.gmra.mrb[0].mxu0 %vm214_vm1, %v209_v3  ;;  %s631_s17 = smov [#allocation6]  }
  0x41   : > { %v211_v4 = vstv %s210_s11  ;;  %p547_p11 = pnand %p546_p8, %p846_p9  ;;  %s549_s29 = sshll.u32 %s631_s17, 4  ;;  %s550_s29 = int_to_ptr.vmem [resolvable:$false] %s549_s29 }
  0x42   : > { %s551_s30 = scalar_lea.vmem %s550_s29, 256  ;;  %p552_p7 = scmp.lt.s32.totalorder %s787_s13, %s550_s29 }
  0x43   : > { %p548_p0 = pneg %p547_p11  ;;  %p553_p13 = scmp.lt.s32.totalorder %s551_s30, %s545_s24 }
  0x45   : > { %p554_p3 = por %p553_p13, %p552_p7 }
  0x47   : > { %p555_p6 = pnand %p554_p3, %p548_p0 }
 0x113   : > { %v289_v5 = vpop.f32.mrb[0].mxu0 }
 0x114   : > { %v290_v6 = vadd.f32 %v289_v5, %v211_v4  ;;  %v291_v7 = vpop.f32.mrb[1].mxu0 }
 0x115   : > { %v292_v8 = vadd.f32 %v291_v7, %v211_v4 }
 0x116   : > { %v434_v9 = vmul.f32 -1.442695, %v290_v6 }
 0x117   : > { %v435_v10 = vmul.f32 -1.442695, %v292_v8 }
 0x118   : > { %507 = vpow2.f32 %v434_v9 }
 0x119   : > { %509 = vpow2.f32 %v435_v10 }
 0x122   : > { %v508_v11 = vpop.eup %507 }
 0x123   : > { %v510_v12 = vpop.eup %509  ;;  %v300_v13 = vadd.f32 1.0, %v508_v11 }
 0x124   : > { %v301_v14 = vadd.f32 1.0, %v510_v12 }
 0x125   : > { %511 = vrcp.f32 %v300_v13 }
 0x126   : > { %513 = vrcp.f32 %v301_v14 }
 0x12f   : > { %v512_v18 = vpop.eup %511 }
 0x130   : > { %v514_v19 = vpop.eup %513  ;;  %v309_v20 = vrot.slane %v512_v18, %v308_v17 }
 0x131   : > { %v313_v21 = vrot.slane %v514_v19, %v308_v17 }
 0x133   : > { %v316_v22 = vcombine.low %v309_v20, %v313_v21 }
 0x135   : > { %v318_v23 = vmul.f32 %v316_v22, %v208_v1 }
 0x137   : > { %319 = vst [vmem:[%s205_s12] sm:$0xff] %v318_v23 }
 0x138   : > { %558 = shalt.err (!%p555_p6)
}
 0x139   : > { %s559_s4 = scalar_lea.hbm %s785_s22, 128  ;;  %s563_s8 = scalar_lea.hbm %s837_s3, 256 }
 0x13a   : > { %p560_p4 = scmp.ne.s32.totalorder %s785_s22, %s559_s4  ;;  %p564_p1 = scmp.lt.u32.totalorder %s785_s22, %s837_s3 }
 0x13b   : > { %p565_p2 = scmp.lt.u32.totalorder %s563_s8, %s559_s4  ;;  %p567_p8 = scmp.lt.u32.totalorder %s559_s4, %s785_s22 }
 0x13c   : > { %p561_p10 = pnand %p560_p4, %p846_p9 }
 0x13d   : > { %p566_p5 = por %p565_p2, %p564_p1 }
 0x13e   : > { %p562_p12 = pneg %p561_p10 }
 0x13f   : > { %p568_p11 = por %p567_p8, %p566_p5 }
 0x141   : > { %p569_p0 = pnand %p568_p11, %p562_p12 }
 0x143   : > { %572 = shalt.err (!%p569_p0)
}
 0x144   : > { %445 = dma.vmem_to_hbm [thread:$0]  (%p846_p9), %s787_s13, 128, %s785_s22, %s321_s23  }
 0x145 PF: > { %s349_s9 = sand.u32 1, %s607_s14   ;;  %p847_p7 = scmp.ne.s32.totalorder %s842_s28, 0 }
 0x146   : > { %p848_p13 = scmp.ge.s32.totalorder %s627_s19, 2  ;;  %s350_s11 = scalar_lea.sflag [#allocation5], %s349_s9 }
 0x148   : > { %p452_p3 = pnand %p848_p13, %p847_p7 }
 0x14a   : > { %602 = dma.done.wait (!%p452_p3), %s350_s11, 128  }
 0x14b   : > { %604 = vsyncadd (!%p452_p3), %s350_s11, 4294967168  ;;  %s20_s19 = sadd.s32 1, %s627_s19   ;;  %s849_s14 = smov %s611_s15 }
 0x14c   : > { %p17_p6 = scmp.ge.s32.totalorder %s20_s19, 4   ;;  %s850_s15 = smov %s615_s16 }
 0x14d   : > { %s851_s16 = smov %s711_s27  ;;  %s852_s17 = smov %s623_s18 }
 0x14e   : > { %s853_s18 = smov %s855_s21  ;;  %19 = sbr.rel (!%p17_p6) target bundleno = 8 (0x8), region = 77 }
 0x155   :  { %355 = vsyncpa [#allocation4], 1 }
 0x156   :  { %357 = vsyncpa [#allocation4 + $0x1], 1 }
 0x157   :  { %358 = vsyncpa [#allocation5], 1 }
 0x158   :  { %360 = vsyncpa [#allocation5 + $0x1], 1 }

</bundles_post_ra>
